<compile_context>
chip_gen: v7x
topology: tpu7x:2x2x1
jax: 0.10.0
libtpu: 0.0.40
codegen_flags: <defaults>
</compile_context>

<pallas_src>
import functools

import jax
import jax.numpy as jnp
from jax import lax
from jax.experimental import pallas as pl
from jax.experimental.pallas import tpu as pltpu


def _cosine_sim_loss_kernel(x_ref, y_ref, o_ref, acc_ref, *,
                            with_norm, c_chunk, n_full, c_rem):
    # x_ref, y_ref: (TB, C, TN) blocks (native dtype); o_ref: (1, TB, 1) f32;
    # acc_ref: (TB, TN) f32 per-lane accumulator, resident across the N grid axis.
    n_idx = pl.program_id(2)

    @pl.when(n_idx == 0)
    def _():
        acc_ref[...] = jnp.zeros_like(acc_ref)

    f32 = jnp.float32

    def chunk_sums(c0, csz):
        # Only `csz` channels are live in f32 at a time (bounded VMEM/vreg use).
        xc = x_ref[:, pl.ds(c0, csz), :].astype(f32)
        yc = y_ref[:, pl.ds(c0, csz), :].astype(f32)
        if with_norm:
            return (jnp.sum(xc * yc, axis=1),
                    jnp.sum(xc * xc, axis=1),
                    jnp.sum(yc * yc, axis=1))
        return (jnp.sum(xc * yc, axis=1),)

    sums = chunk_sums(0, c_chunk)
    if n_full > 1:
        if n_full <= 8:
            # Short chunk count: static unroll (LLO-visible straight-line adds).
            for ci in range(1, n_full):
                sums = tuple(a + b for a, b in
                             zip(sums, chunk_sums(ci * c_chunk, c_chunk)))
        else:
            def body(ci, carry):
                c0 = pl.multiple_of(ci * c_chunk, c_chunk)
                return tuple(a + b for a, b in zip(carry, chunk_sums(c0, c_chunk)))
            sums = lax.fori_loop(1, n_full, body, sums)
    if c_rem:
        sums = tuple(a + b for a, b in
                     zip(sums, chunk_sums(n_full * c_chunk, c_rem)))

    if with_norm:
        # F.normalize: x / max(||x||_2, eps), eps=1e-12.
        # max(sqrt(s), eps) == sqrt(max(s, eps^2)) -> rsqrt (EUP slot) on clamped
        # squared norms instead of materializing normalized tensors.
        s_xy, s_xx, s_yy = sums
        eps2 = f32(1e-24)
        prod = s_xy * lax.rsqrt(jnp.maximum(s_xx, eps2)) \
                    * lax.rsqrt(jnp.maximum(s_yy, eps2))
    else:
        prod = sums[0]

    # Per-lane partial sums across the N grid axis (pure VALU adds); the single
    # XLU cross-lane reduce and narrow store happen only once, below.
    acc_ref[...] += prod

    @pl.when(n_idx == pl.num_programs(2) - 1)
    def _():
        o_ref[...] = jnp.sum(acc_ref[...], axis=-1, keepdims=True)[None]


def _round_up(x, m):
    return (x + m - 1) // m * m


def _choose_tiles(B, C, N, itemsize):
    """Pick (tb, b_pad, tn, n_pad, n_split, c_chunk, vmem_limit)."""
    # Per-generation VMEM budget: v5e/v6e 128 MiB, v7x 64 MiB per TensorCore.
    try:
        vmem_cap = int(pltpu.get_tpu_info().vmem_capacity_bytes)
    except Exception:
        vmem_cap = 64 * 1024 * 1024            # assume the smallest (v7x)
    vmem_limit = min(vmem_cap * 3 // 4, 96 * 1024 * 1024)
    usable = int(vmem_limit * 0.8)             # headroom for internal scratch

    n_pad128 = _round_up(N, 128)
    c_chunk = min(C, 32)

    # Bytes of VMEM needed per lane-column of one grid step at batch tile tb:
    #   2 inputs x 2 pipeline buffers x C channels (native dtype)
    # + ~4 f32 chunk temporaries of c_chunk channels (xc, yc, products)
    # + ~6 f32 per-lane rows (s_xy, s_xx, s_yy, prod, acc, slack).
    def lane_bytes(tb_):
        return tb_ * (4 * C * itemsize + 4 * c_chunk * 4 + 6 * 4)

    # Batch tiling. Never pad B beyond the next multiple of 8 (padded rows are
    # streamed zeros = wasted HBM bandwidth); grow tb only when it divides b_pad
    # and still leaves room for >=512-lane tiles (long contiguous DMA runs).
    if B <= 8:
        tb, b_pad = B, B
    else:
        b_pad = _round_up(B, 8)
        tb = 8
        for cand in (32, 16):
            if b_pad % cand == 0 and \
               (usable // lane_bytes(cand)) >= min(n_pad128, 512):
                tb = cand
                break

    # Lane tiling: largest multiple of 128 that fits the budget; capped at full
    # padded N (then every (b, c) row is a single contiguous HBM transfer).
    tn = (usable // lane_bytes(tb) // 128) * 128
    tn = max(128, min(tn, n_pad128, 32768))

    # Megacore (v7x) occupancy: with a single batch tile, split the N reduction
    # over a leading "parallel" grid axis.  Only when it is (almost) free in
    # extra padded traffic; on 1-TC chips the split is harmless.
    n_tiles = -(-N // tn)                      # cdiv
    n_split = 1
    if b_pad // tb == 1 and n_tiles >= 2:
        if n_tiles % 2 == 0:
            n_split = 2
        elif n_tiles >= 7:                     # extra padded tile <= ~1/7 traffic
            n_split = 2
            n_tiles += 1
    n_pad = n_tiles * tn
    return tb, b_pad, tn, n_pad, n_split, c_chunk, vmem_limit


def cosine_sim_loss(cls_score, label, *, with_norm=True, negative=False):
    """CosineSimLoss forward (pairwise=False path). Inputs are NCHW (B, C, H, W)."""
    assert cls_score.shape == label.shape
    B, C = cls_score.shape[0], cls_score.shape[1]
    x = cls_score.reshape(B, C, -1)            # (B, C, N), native dtype (bf16 ok)
    y = label.reshape(B, C, -1)
    N = x.shape[-1]

    itemsize = x.dtype.itemsize
    tb, b_pad, tn, n_pad, n_split, c_chunk, vmem_limit = _choose_tiles(
        B, C, N, itemsize)

    if (b_pad, n_pad) != (B, N):
        # Zero padding is exact: padded lanes/rows give s_xx=s_yy=s_xy=0 -> prod=0,
        # so they add nothing to the accumulator; the mean uses the true 1/N below.
        pad = ((0, b_pad - B), (0, 0), (0, n_pad - N))
        x = jnp.pad(x, pad)
        y = jnp.pad(y, pad)

    n_full, c_rem = divmod(C, c_chunk)
    kernel = functools.partial(
        _cosine_sim_loss_kernel,
        with_norm=with_norm, c_chunk=c_chunk, n_full=n_full, c_rem=c_rem)

    n_per_split = (n_pad // tn) // n_split
    grid = (n_split, b_pad // tb, n_per_split)

    def in_index(s, b, n):
        return (b, 0, s * n_per_split + n)

    in_spec = pl.BlockSpec((tb, C, tn), in_index)

    flops_per_elt = 6 if with_norm else 2
    cost = pl.CostEstimate(
        flops=flops_per_elt * B * C * N,
        transcendentals=(2 * B * N) if with_norm else 0,
        bytes_accessed=2 * b_pad * C * n_pad * itemsize + n_split * b_pad * 4)

    out = pl.pallas_call(
        kernel,
        out_shape=jax.ShapeDtypeStruct((n_split, b_pad, 1), jnp.float32),
        grid=grid,
        in_specs=[in_spec, in_spec],
        # Output block constant along the N axis -> resident accumulator target,
        # written once per (split, batch) tile in the final N step.
        out_specs=pl.BlockSpec((1, tb, 1), lambda s, b, n: (s, b, 0)),
        scratch_shapes=[pltpu.VMEM((tb, tn), jnp.float32)],
        compiler_params=pltpu.CompilerParams(
            dimension_semantics=("parallel", "parallel", "arbitrary"),
            vmem_limit_bytes=vmem_limit),
        cost_estimate=cost,
    )(x, y)                                    # (n_split, b_pad, 1) partial sums

    total = jnp.sum(out[:, :B, 0], axis=0)     # (B,) sum of prod over all lanes
    mean = total * jnp.float32(1.0 / N)
    if negative:
        return -mean
    return 2.0 - 2.0 * mean


def _reference(cls_score, label, *, with_norm=True, negative=False):
    """Pure-JAX reference mirroring the PyTorch forward (pairwise=False)."""
    if with_norm:
        def _norm(t):
            n = jnp.sqrt(jnp.sum(t * t, axis=1, keepdims=True))
            return t / jnp.maximum(n, 1e-12)
        cls_score = _norm(cls_score)
        label = _norm(label)
    prod = jnp.sum(cls_score * label, axis=1).reshape(cls_score.shape[0], -1)
    if negative:
        return -jnp.mean(prod, axis=-1)
    return 2.0 - 2.0 * jnp.mean(prod, axis=-1)


if __name__ == "__main__":
    key = jax.random.PRNGKey(0)
    ks = jax.random.split(key, 8)

    # 1) Primary small test at the module-implied shape: B=2, C=4, H=W=16 (N=256).
    B, C, H, W = 2, 4, 16, 16
    cls_score = jax.random.normal(ks[0], (B, C, H, W), dtype=jnp.float32)
    label = jax.random.normal(ks[1], (B, C, H, W), dtype=jnp.float32)
    loss = jax.block_until_ready(cosine_sim_loss(cls_score, label))
    ref = _reference(cls_score, label)
    assert loss.shape == (B,)
    assert jnp.allclose(loss, ref, rtol=1e-4, atol=1e-5), (loss, ref)

    # 2) Ragged N (576) with native bf16 inputs (DMA'd as bf16, upcast in-register).
    B2, C2, H2, W2 = 3, 8, 24, 24
    xs = jax.random.normal(ks[2], (B2, C2, H2, W2), dtype=jnp.bfloat16)
    ys = jax.random.normal(ks[3], (B2, C2, H2, W2), dtype=jnp.bfloat16)
    loss2 = jax.block_until_ready(cosine_sim_loss(xs, ys))
    ref2 = _reference(xs.astype(jnp.float32), ys.astype(jnp.float32))
    assert loss2.shape == (B2,)
    assert jnp.allclose(loss2, ref2, rtol=2e-2, atol=2e-2), (loss2, ref2)

    # 3) negative=True and with_norm=False branches.
    loss3 = jax.block_until_ready(cosine_sim_loss(cls_score, label, negative=True))
    ref3 = _reference(cls_score, label, negative=True)
    assert jnp.allclose(loss3, ref3, rtol=1e-4, atol=1e-5), (loss3, ref3)
    loss4 = jax.block_until_ready(cosine_sim_loss(cls_score, label, with_norm=False))
    ref4 = _reference(cls_score, label, with_norm=False)
    assert jnp.allclose(loss4, ref4, rtol=1e-4, atol=1e-5), (loss4, ref4)

    # 4) Chunked channel reduction: static-unroll path (C=72 -> 2 chunks + rem 8).
    B5, C5, H5, W5 = 2, 72, 8, 8
    x5 = jax.random.normal(ks[4], (B5, C5, H5, W5), dtype=jnp.float32)
    y5 = jax.random.normal(ks[5], (B5, C5, H5, W5), dtype=jnp.float32)
    loss5 = jax.block_until_ready(cosine_sim_loss(x5, y5))
    ref5 = _reference(x5, y5)
    assert jnp.allclose(loss5, ref5, rtol=1e-4, atol=1e-4), (loss5, ref5)

    # 5) Chunked channel reduction: fori_loop path (C=296 -> 9 chunks + rem 8),
    #    plus B>8 batch tiling (B=16).
    B6, C6, H6, W6 = 2, 296, 8, 8
    x6 = jax.random.normal(ks[6], (B6, C6, H6, W6), dtype=jnp.float32)
    y6 = jax.random.normal(ks[7], (B6, C6, H6, W6), dtype=jnp.float32)
    loss6 = jax.block_until_ready(cosine_sim_loss(x6, y6))
    ref6 = _reference(x6, y6)
    assert jnp.allclose(loss6, ref6, rtol=1e-4, atol=1e-4), (loss6, ref6)

    x7 = jax.random.normal(ks[6], (16, 4, 8, 8), dtype=jnp.float32)
    y7 = jax.random.normal(ks[7], (16, 4, 8, 8), dtype=jnp.float32)
    loss7 = jax.block_until_ready(cosine_sim_loss(x7, y7))
    ref7 = _reference(x7, y7)
    assert loss7.shape == (16,)
    assert jnp.allclose(loss7, ref7, rtol=1e-4, atol=1e-4), (loss7, ref7)

    print("KERNEL_OK")
</pallas_src>

<mosaic_0001>
module attributes {stable_mosaic.version = 11 : i64} {
  func.func @_cosine_sim_loss_kernel(%arg0: i32, %arg1: i32, %arg2: i32, %arg3: memref<2x4x256xf32, #tpu.memory_space<vmem>>, %arg4: memref<2x4x256xf32, #tpu.memory_space<vmem>>, %arg5: memref<1x2x1xf32, #tpu.memory_space<vmem>>, %arg6: memref<2x256xf32, #tpu.memory_space<vmem>>) attributes {dimension_semantics = [#tpu.dimension_semantics<parallel>, #tpu.dimension_semantics<parallel>, #tpu.dimension_semantics<arbitrary>], iteration_bounds = array<i64: 1, 1, 1>, scalar_prefetch = 0 : i64, scratch_operands = 1 : i64, tpu.core_type = #tpu.core_type<tc>, window_params = [{transform_indices = @transform_0, window_bounds = array<i64: 2, 4, 256>}, {transform_indices = @transform_1, window_bounds = array<i64: 2, 4, 256>}, {transform_indices = @transform_2, window_bounds = array<i64: 1, 2, 1>}]} {
    %c0_i32 = arith.constant 0 : i32
    %0 = arith.cmpi eq, %arg2, %c0_i32 : i32
    %1 = arith.extui %0 : i1 to i32
    %c0_i32_0 = arith.constant 0 : i32
    %2 = arith.cmpi ne, %1, %c0_i32_0 : i32
    scf.if %2 {
      %cst_16 = arith.constant 0.000000e+00 : f32
      %25 = vector.broadcast %cst_16 : f32 to vector<2x256xf32>
      %c0_17 = arith.constant 0 : index
      %c0_18 = arith.constant 0 : index
      %26 = vector.load %arg6[%c0_17, %c0_18] : memref<2x256xf32, #tpu.memory_space<vmem>>, vector<2x256xf32>
      tpu.vector_store %arg6[%c0_17, %c0_18], %25 {strides = array<i32>} : memref<2x256xf32, #tpu.memory_space<vmem>>, vector<2x256xf32>,
    } else {
    }
    %c0 = arith.constant 0 : index
    %c0_1 = arith.constant 0 : index
    %c0_2 = arith.constant 0 : index
    %3 = vector.load %arg3[%c0, %c0_1, %c0_2] : memref<2x4x256xf32, #tpu.memory_space<vmem>>, vector<2x4x256xf32>
    %c0_3 = arith.constant 0 : index
    %c0_4 = arith.constant 0 : index
    %c0_5 = arith.constant 0 : index
    %4 = vector.load %arg4[%c0_3, %c0_4, %c0_5] : memref<2x4x256xf32, #tpu.memory_space<vmem>>, vector<2x4x256xf32>
    %5 = arith.mulf %3, %4 : vector<2x4x256xf32>
    %cst = arith.constant dense<0.000000e+00> : vector<2x256xf32>
    %6 = vector.multi_reduction <add>, %5, %cst [1] : vector<2x4x256xf32> to vector<2x256xf32>
    %7 = arith.mulf %3, %3 : vector<2x4x256xf32>
    %cst_6 = arith.constant dense<0.000000e+00> : vector<2x256xf32>
    %8 = vector.multi_reduction <add>, %7, %cst_6 [1] : vector<2x4x256xf32> to vector<2x256xf32>
    %9 = arith.mulf %4, %4 : vector<2x4x256xf32>
    %cst_7 = arith.constant dense<0.000000e+00> : vector<2x256xf32>
    %10 = vector.multi_reduction <add>, %9, %cst_7 [1] : vector<2x4x256xf32> to vector<2x256xf32>
    %cst_8 = arith.constant 1.000000e-24 : f32
    %11 = vector.broadcast %cst_8 : f32 to vector<2x256xf32>
    %12 = arith.maximumf %8, %11 : vector<2x256xf32>
    %13 = math.rsqrt %12 : vector<2x256xf32>
    %14 = arith.mulf %6, %13 : vector<2x256xf32>
    %cst_9 = arith.constant 1.000000e-24 : f32
    %15 = vector.broadcast %cst_9 : f32 to vector<2x256xf32>
    %16 = arith.maximumf %10, %15 : vector<2x256xf32>
    %17 = math.rsqrt %16 : vector<2x256xf32>
    %18 = arith.mulf %14, %17 : vector<2x256xf32>
    %c0_10 = arith.constant 0 : index
    %c0_11 = arith.constant 0 : index
    %19 = vector.load %arg6[%c0_10, %c0_11] : memref<2x256xf32, #tpu.memory_space<vmem>>, vector<2x256xf32>
    %20 = arith.addf %19, %18 : vector<2x256xf32>
    %c0_12 = arith.constant 0 : index
    %c0_13 = arith.constant 0 : index
    %21 = vector.load %arg6[%c0_12, %c0_13] : memref<2x256xf32, #tpu.memory_space<vmem>>, vector<2x256xf32>
    tpu.vector_store %arg6[%c0_12, %c0_13], %20 {strides = array<i32>} : memref<2x256xf32, #tpu.memory_space<vmem>>, vector<2x256xf32>,
    %c0_i32_14 = arith.constant 0 : i32
    %22 = arith.cmpi eq, %arg2, %c0_i32_14 : i32
    %23 = arith.extui %22 : i1 to i32
    %c0_i32_15 = arith.constant 0 : i32
    %24 = arith.cmpi ne, %23, %c0_i32_15 : i32
    scf.if %24 {
      %c0_16 = arith.constant 0 : index
      %c0_17 = arith.constant 0 : index
      %25 = vector.load %arg6[%c0_16, %c0_17] : memref<2x256xf32, #tpu.memory_space<vmem>>, vector<2x256xf32>
      %cst_18 = arith.constant dense<0.000000e+00> : vector<2xf32>
      %26 = vector.multi_reduction <add>, %25, %cst_18 [1] : vector<2x256xf32> to vector<2xf32>
      %27 = vector.shape_cast %26 : vector<2xf32> to vector<2x1xf32>
      %28 = vector.shape_cast %27 : vector<2x1xf32> to vector<1x2x1xf32>
      %c0_19 = arith.constant 0 : index
      %c0_20 = arith.constant 0 : index
      %c0_21 = arith.constant 0 : index
      %29 = vector.load %arg5[%c0_19, %c0_20, %c0_21] : memref<1x2x1xf32, #tpu.memory_space<vmem>>, vector<1x2x1xf32>
      tpu.vector_store %arg5[%c0_19, %c0_20, %c0_21], %28 {strides = array<i32>} : memref<1x2x1xf32, #tpu.memory_space<vmem>>, vector<1x2x1xf32>,
    } else {
    }
    return
  }
  func.func @transform_0(%arg0: i32, %arg1: i32, %arg2: i32) -> (i32, i32, i32) {
    %c1_i32 = arith.constant 1 : i32
    %0 = arith.muli %arg0, %c1_i32 : i32
    %1 = arith.addi %0, %arg2 : i32
    %c0_i32 = arith.constant 0 : i32
    %c0_i32_0 = arith.constant 0 : i32
    return %arg1, %c0_i32, %1 : i32, i32, i32
  }
  func.func @transform_1(%arg0: i32, %arg1: i32, %arg2: i32) -> (i32, i32, i32) {
    %c1_i32 = arith.constant 1 : i32
    %0 = arith.muli %arg0, %c1_i32 : i32
    %1 = arith.addi %0, %arg2 : i32
    %c0_i32 = arith.constant 0 : i32
    %c0_i32_0 = arith.constant 0 : i32
    return %arg1, %c0_i32, %1 : i32, i32, i32
  }
  func.func @transform_2(%arg0: i32, %arg1: i32, %arg2: i32) -> (i32, i32, i32) {
    %c0_i32 = arith.constant 0 : i32
    %c0_i32_0 = arith.constant 0 : i32
    return %arg0, %arg1, %c0_i32 : i32, i32, i32
  }
}

</mosaic_0001>

<bundles_post_ra>
// kernel: tpu_custom_call.1
= control target key start
LH: loop header
LB: loop body
LE: loop exit
PB: predicated region body
PF: predicated region fallthrough
CT: control target
= control target key end

     0   :  { %7 = vsyncpa [#allocation4], 0  ;;  %s390_s0 = inlined_call_operand.hbm [shape: f32[2,4,256], index: 0, kind: input, shape index: {}]   ;;  %s391_s1 = inlined_call_operand.hbm [shape: f32[2,4,256], index: 1, kind: input, shape index: {}]   ;;  %s392_s2 = inlined_call_operand.vmem [shape: f32[1,2,1], index: 2, kind: output, shape index: {}]  }
   0x1   :  { %8 = vsyncpa [#allocation6], 0  ;;  %s330_s9 = smov [#allocation3]   ;;  %s282_s13 = scalar_lea.hbm %s390_s0, 256 }
   0x2   :  { %s18_s10 = sshll.u32 %s330_s9, 4  ;;  %p283_p0 = scmp.ne.s32.totalorder %s390_s0, %s282_s13  ;;  %s19_s10 = int_to_ptr.vmem [resolvable:$true] %s18_s10 }
   0x3   :  { %p286_p1 = scmp.lt.u32.totalorder %s282_s13, %s390_s0 }
   0x5   :  { %p288_p2 = pnand %p286_p1, %p283_p0 }
   0x7   :  { %291 = shalt.err (!%p288_p2)
}
   0x8   :  { %s292_s18 = scalar_lea.vmem %s19_s10, 256  ;;  %p297_p4 = scmp.lt.s32.totalorder %s19_s10, %s19_s10 }
   0x9   :  { %p293_p3 = scmp.ne.s32.totalorder %s19_s10, %s292_s18  ;;  %p298_p5 = scmp.lt.s32.totalorder %s292_s18, %s292_s18 }
   0xb   :  { %p299_p6 = por %p298_p5, %p297_p4 }
   0xd   :  { %p300_p7 = pnand %p299_p6, %p293_p3 }
   0xf   :  { %303 = shalt.err (!%p300_p7)
}
  0x10   :  { %s331_s19 = smov 128   ;;  %s332_s20 = smov 8  }
  0x11   :  { %24 = dma.hbm_to_vmem [thread:$0]  %s390_s0, 256, %s19_s10, [#allocation4], %s331_s19, %s331_s19, %s332_s20  }
  0x12   :  { %s333_s23 = smov [#allocation5]   ;;  %s304_s27 = scalar_lea.hbm %s391_s1, 256 }
  0x13   :  { %s34_s24 = sshll.u32 %s333_s23, 4  ;;  %p305_p8 = scmp.ne.s32.totalorder %s391_s1, %s304_s27  ;;  %s35_s24 = int_to_ptr.vmem [resolvable:$true] %s34_s24 }
  0x14   :  { %p308_p9 = scmp.lt.u32.totalorder %s304_s27, %s391_s1 }
  0x16   :  { %p310_p10 = pnand %p308_p9, %p305_p8 }
  0x18   :  { %313 = shalt.err (!%p310_p10)
}
  0x19   :  { %s314_s4 = scalar_lea.vmem %s35_s24, 256  ;;  %p319_p12 = scmp.lt.s32.totalorder %s35_s24, %s35_s24 }
  0x1a   :  { %p315_p11 = scmp.ne.s32.totalorder %s35_s24, %s314_s4  ;;  %p320_p13 = scmp.lt.s32.totalorder %s314_s4, %s314_s4 }
  0x1c   :  { %p321_p0 = por %p320_p13, %p319_p12 }
  0x1e   :  { %p322_p1 = pnand %p321_p0, %p315_p11 }
  0x20   :  { %325 = shalt.err (!%p322_p1)
}
  0x21   :  { %40 = dma.hbm_to_vmem [thread:$0]  %s391_s1, 256, %s35_s24, [#allocation6], %s331_s19, %s331_s19, %s332_s20  }
  0x22   :  { %326 = dma.done.wait [#allocation4], 256  }
  0x23   :  { %327 = vsyncadd [#allocation4], 4294967040 }
  0x24   :  { %328 = dma.done.wait [#allocation6], 256  }
  0x25   :  { %329 = vsyncadd [#allocation6], 4294967040  ;;  %v334_v0 = vmov 0.0   ;;  %v56_v1 = vld [vmem:[#allocation3] sm:$0xff]  ;;  %v57_v2 = vld [vmem:[#allocation3 + $0x8] sm:$0xff]  ;;  %vm68_vm0 = vcmask 1043456  }
  0x26   :  { %55 = vst [vmem:[#allocation2] sm:$0xf] %v334_v0  ;;  %v97_v3 = vmul.f32 %v56_v1, %v56_v1  ;;  %v98_v4 = vmul.f32 %v57_v2, %v57_v2  ;;  %v58_v5 = vld [vmem:[#allocation5] sm:$0xff]  ;;  %v59_v7 = vld [vmem:[#allocation5 + $0x8] sm:$0xff]  ;;  %vm219_vm1 = vcmask 1041409   ;;  %vm221_vm2 = vcmask 1043459  }
  0x27   :  { %v60_v8 = vmul.f32 %v58_v5, %v56_v1  ;;  %v61_v10 = vmul.f32 %v59_v7, %v57_v2  ;;  %v133_v29 = vmul.f32 %v58_v5, %v58_v5  ;;  %v134_v33 = vmul.f32 %v59_v7, %v59_v7 }
  0x28   :  { %v101_v6 = vcombine.high %v97_v3, %v97_v3  ;;  %v105_v9 = vsel %vm68_vm0, %v97_v3, 0.0  ;;  %v102_v11 = vcombine.high %v98_v4, %v98_v4  ;;  %v119_v16 = vsel %vm68_vm0, %v98_v4, 0.0 }
  0x29   :  { %v106_v12 = vrot.slane %v105_v9, 4  ;;  %v69_v17 = vsel %vm68_vm0, %v60_v8, 0.0  ;;  %v120_v19 = vrot.slane %v119_v16, 4  ;;  %v64_v20 = vcombine.high %v60_v8, %v60_v8 }
  0x2a   :  { %v112_v13 = vsel %vm68_vm0, %v101_v6, 0.0  ;;  %v65_v21 = vcombine.high %v61_v10, %v61_v10  ;;  %v126_v23 = vsel %vm68_vm0, %v102_v11, 0.0  ;;  %v70_v26 = vrot.slane %v69_v17, 4 }
  0x2b   :  { %v113_v14 = vrot.slane %v112_v13, 4  ;;  %v107_v15 = vadd.f32 %v106_v12, %v105_v9  ;;  %v121_v25 = vadd.f32 %v120_v19, %v119_v16  ;;  %v127_v28 = vrot.slane %v126_v23, 4 }
  0x2c   :  { %v83_v30 = vsel %vm68_vm0, %v61_v10, 0.0  ;;  %v76_v34 = vsel %vm68_vm0, %v64_v20, 0.0  ;;  %v90_v35 = vsel %vm68_vm0, %v65_v21, 0.0  ;;  %v71_v40 = vadd.f32 %v70_v26, %v69_v17 }
  0x2d   :  { %v114_v18 = vadd.f32 %v113_v14, %v112_v13  ;;  %v108_v22 = vrot.slane %v107_v15, 2  ;;  %v122_v32 = vrot.slane %v121_v25, 2  ;;  %v128_v37 = vadd.f32 %v127_v28, %v126_v23 }
  0x2e   :  { %v84_v41 = vrot.slane %v83_v30, 4  ;;  %v77_v43 = vrot.slane %v76_v34, 4  ;;  %v91_v44 = vrot.slane %v90_v35, 4  ;;  %v137_v46 = vcombine.high %v133_v29, %v133_v29 }
  0x2f   :  { %v115_v24 = vrot.slane %v114_v18, 2  ;;  %v109_v27 = vadd.f32 %v108_v22, %v107_v15  ;;  %v123_v39 = vadd.f32 %v122_v32, %v121_v25  ;;  %v129_v42 = vrot.slane %v128_v37, 2 }
  0x30   :  { %v138_v49 = vcombine.high %v134_v33, %v134_v33  ;;  %v141_v50 = vsel %vm68_vm0, %v133_v29, 0.0  ;;  %v148_v53 = vsel %vm68_vm0, %v137_v46, 0.0  ;;  %v155_v54 = vsel %vm68_vm0, %v134_v33, 0.0 }
  0x31   :  { %v116_v31 = vadd.f32 %v115_v24, %v114_v18  ;;  %v110_v36 = vrot.slane %v109_v27, 1  ;;  %v124_v45 = vrot.slane %v123_v39, 1  ;;  %v130_v48 = vadd.f32 %v129_v42, %v128_v37 }
  0x32   :  { %v142_v52 = vrot.slane %v141_v50, 4  ;;  %v149_v56 = vrot.slane %v148_v53, 4  ;;  %v156_v57 = vrot.slane %v155_v54, 4  ;;  %v162_v58 = vsel %vm68_vm0, %v138_v49, 0.0 }
  0x33   :  { %v117_v38 = vrot.slane %v116_v31, 1  ;;  %v111_v47 = vadd.f32 %v110_v36, %v109_v27  ;;  %v131_v55 = vrot.slane %v130_v48, 1  ;;  %v78_v59 = vadd.f32 %v77_v43, %v76_v34 }
  0x34   :  { %v125_v60 = vadd.f32 %v124_v45, %v123_v39  ;;  %v143_v61 = vadd.f32 %v142_v52, %v141_v50  ;;  %v163_v62 = vrot.slane %v162_v58, 4  ;;  %v85_v63 = vadd.f32 %v84_v41, %v83_v30 }
  0x35   :  { %v118_v51 = vadd.f32 %v117_v38, %v116_v31  ;;  %v132_v0 = vadd.f32 %v131_v55, %v130_v48  ;;  %v150_v1 = vadd.f32 %v149_v56, %v148_v53  ;;  %v157_v2 = vadd.f32 %v156_v57, %v155_v54 }
  0x36   :  { %v92_v3 = vadd.f32 %v91_v44, %v90_v35  ;;  %v144_v4 = vrot.slane %v143_v61, 2  ;;  %v164_v5 = vadd.f32 %v163_v62, %v162_v58  ;;  %v169_v6 = vmax.f32 %v111_v47, 1e-24 }
  0x37   :  { %v72_v7 = vrot.slane %v71_v40, 2  ;;  %v151_v8 = vrot.slane %v150_v1, 2  ;;  %v158_v9 = vrot.slane %v157_v2, 2  ;;  %v170_v10 = vmax.f32 %v118_v51, 1e-24 }
  0x38   :  { %v79_v11 = vrot.slane %v78_v59, 2  ;;  %v145_v12 = vadd.f32 %v144_v4, %v143_v61  ;;  %v165_v13 = vrot.slane %v164_v5, 2  ;;  %v171_v14 = vmax.f32 %v125_v60, 1e-24 }
  0x39   :  { %v86_v15 = vrot.slane %v85_v63, 2  ;;  %v152_v16 = vadd.f32 %v151_v8, %v150_v1  ;;  %v159_v17 = vadd.f32 %v158_v9, %v157_v2  ;;  %v172_v18 = vmax.f32 %v132_v0, 1e-24  ;;  %v193_v9 = vld [vmem:[#allocation2] sm:$0xf] }
  0x3a   :  { %v93_v19 = vrot.slane %v92_v3, 2  ;;  %v146_v20 = vrot.slane %v145_v12, 1  ;;  %v166_v21 = vadd.f32 %v165_v13, %v164_v5  ;;  %266 = vrsqrt.f32 %v169_v6 }
  0x3b   :  { %v73_v22 = vadd.f32 %v72_v7, %v71_v40  ;;  %v153_v23 = vrot.slane %v152_v16, 1  ;;  %v160_v24 = vrot.slane %v159_v17, 1  ;;  %268 = vrsqrt.f32 %v170_v10 }
  0x3c   :  { %v80_v25 = vadd.f32 %v79_v11, %v78_v59  ;;  %v147_v26 = vadd.f32 %v146_v20, %v145_v12  ;;  %v167_v27 = vrot.slane %v166_v21, 1  ;;  %270 = vrsqrt.f32 %v171_v14 }
  0x3d   :  { %v87_v28 = vadd.f32 %v86_v15, %v85_v63  ;;  %v154_v29 = vadd.f32 %v153_v23, %v152_v16  ;;  %v161_v30 = vadd.f32 %v160_v24, %v159_v17  ;;  %272 = vrsqrt.f32 %v172_v18 }
  0x3e   :  { %v94_v31 = vadd.f32 %v93_v19, %v92_v3  ;;  %v168_v32 = vadd.f32 %v167_v27, %v166_v21  ;;  %v181_v33 = vmax.f32 %v147_v26, 1e-24  ;;  %v74_v34 = vrot.slane %v73_v22, 1 }
  0x3f   :  { %v182_v35 = vmax.f32 %v154_v29, 1e-24  ;;  %v183_v36 = vmax.f32 %v161_v30, 1e-24  ;;  %v81_v37 = vrot.slane %v80_v25, 1  ;;  %v88_v39 = vrot.slane %v87_v28, 1 }
  0x40   :  { %v184_v38 = vmax.f32 %v168_v32, 1e-24  ;;  %274 = vrsqrt.f32 %v181_v33  ;;  %v95_v40 = vrot.slane %v94_v31, 1  ;;  %v75_v41 = vadd.f32 %v74_v34, %v73_v22 }
  0x41   :  { %276 = vrsqrt.f32 %v182_v35  ;;  %v82_v43 = vadd.f32 %v81_v37, %v80_v25  ;;  %v89_v45 = vadd.f32 %v88_v39, %v87_v28  ;;  %v335_v48 = vmov 1983009808  }
  0x42   :  { %278 = vrsqrt.f32 %v183_v36  ;;  %v96_v47 = vadd.f32 %v95_v40, %v94_v31  ;;  %v200_v49 = vunpack.c.l.s4 %v335_v48  ;;  %v202_v50 = vlaneseq }
  0x43   :  { %280 = vrsqrt.f32 %v184_v38  ;;  %vm223_vm3 = vcmask 1045509   ;;  %vm225_vm4 = vcmask 1047559   ;;  %vm245_vm5 = vcmask 1041408  }
  0x44   :  { %v267_v42 = vpop.eup %266  ;;  %v201_v57 = vunpack.c.0.s8 %v200_v49  ;;  %v203_v58 = vshrl.u32 %v202_v50, 7  ;;  %vm251_vm6 = vcmask 1024  }
  0x45   :  { %v269_v44 = vpop.eup %268  ;;  %v177_v52 = vmul.f32 %v267_v42, %v75_v41 }
  0x46   :  { %v271_v46 = vpop.eup %270  ;;  %v178_v53 = vmul.f32 %v269_v44, %v82_v43  ;;  %v204_v3 = vsub.s32 %v201_v57, %v203_v58 }
  0x47   :  { %v273_v51 = vpop.eup %272  ;;  %v179_v54 = vmul.f32 %v271_v46, %v89_v45 }
  0x48   :  { %v180_v56 = vmul.f32 %v273_v51, %v96_v47 }
  0x4a   :  { %v275_v55 = vpop.eup %274 }
  0x4b   :  { %v277_v59 = vpop.eup %276  ;;  %v189_v60 = vmul.f32 %v275_v55, %v177_v52 }
  0x4c   :  { %v279_v61 = vpop.eup %278  ;;  %v190_v62 = vmul.f32 %v277_v59, %v178_v53 }
  0x4d   :  { %v281_v63 = vpop.eup %280  ;;  %v191_v0 = vmul.f32 %v279_v61, %v179_v54 }
  0x4e   :  { %v192_v1 = vmul.f32 %v281_v63, %v180_v56  ;;  %v198_v2 = vcombine.low %v189_v60, %v190_v62 }
  0x50   :  { %v206_v4 = vcombine.low %v191_v0, %v192_v1  ;;  %v205_v5 = vrot.slane %v198_v2, %v204_v3 }
  0x52   :  { %v213_v6 = vrot.slane %v206_v4, %v204_v3 }
  0x54   :  { %v218_v7 = vrot.slane %v213_v6, 7 }
  0x56   :  { %v220_v8 = vsel %vm219_vm1, %v218_v7, %v205_v5 }
  0x57   :  { %v222_v10 = vsel %vm221_vm2, %v218_v7, %v220_v8 }
  0x58   :  { %v224_v11 = vsel %vm223_vm3, %v218_v7, %v222_v10 }
  0x59   :  { %v226_v12 = vsel %vm225_vm4, %v218_v7, %v224_v11 }
  0x5a   :  { %v228_v13 = vadd.f32 %v226_v12, %v193_v9 }
  0x5c   :  { %229 = vst [vmem:[#allocation2] sm:$0xf] %v228_v13 }
  0x63   :  { %v259_v14 = vld.sshfl [vmem:[#allocation2] sm:$0x33 pattern:$0x76325410] }
  0x64   :  { %v242_v15 = vcombine.high %v259_v14, %v259_v14  ;;  %v246_v16 = vsel %vm245_vm5, %v259_v14, 0.0 }
  0x66   :  { %v247_v17 = vsel %vm245_vm5, %v242_v15, 0.0 }
  0x67   :  { %v248_v18 = vadd.f32 %v247_v17, %v246_v16 }
  0x69   :  { %249 = vadd.xlane.f32.xlu0 %v248_v18 }
  0xf6   :  { %v250_v19 = vpop.xlane.xlu0 %249 }
  0xf7   :  { %252 = vst.msk [vmem:[%s392_s2] sm:$0x3] %vm251_vm6, %v250_v19 }
  0xf8   :  { %257 = vsyncpa [#allocation4], 1 }
  0xf9   :  { %258 = vsyncpa [#allocation6], 1 }

</bundles_post_ra>
